<compile_context>
chip_gen: v6e
topology: v6e:2x2x1
jax: 0.10.0
libtpu: 0.0.40
codegen_flags: <defaults>
</compile_context>

<pallas_src>
import jax
import jax.numpy as jnp
from jax.experimental import pallas as pl
from jax.experimental.pallas import tpu as pltpu


def _copy_kernel(x_ref, o_ref):
    # Straight copy of the current (row_tile, lanes) lane-dense block.
    o_ref[...] = x_ref[...]


def _pick_slab(total, dtype_bytes, *, max_lanes=4096, tile_budget_bytes=2 << 20):
    """Factor `total` elements into a lane-dense (rows, lanes) slab + row tile.

    Returns (rows, lanes, row_tile) or None if no lane-aligned factorization
    exists (caller then falls back to the metadata-only reshape).
    """
    if total <= 0 or total % 128 != 0:
        return None

    # Lane width: multiple of 128 that divides `total`.  Prefer choices where
    # rows % 8 == 0 (full sublane utilization), then the largest lane width.
    best = None  # (key=(rows%8==0, L), L, rows)
    lanes = 128
    while lanes <= min(total, max_lanes):
        if total % lanes == 0:
            rows = total // lanes
            key = (rows % 8 == 0, lanes)
            if best is None or key > best[0]:
                best = (key, lanes, rows)
        lanes += 128
    _, lanes, rows = best

    # Row tile: largest divisor of `rows` that fits the per-tile VMEM budget
    # and keeps the sublane dim either a multiple of 8 or the full extent
    # (both legal for BlockSpec).
    max_rows = max(1, tile_budget_bytes // (lanes * dtype_bytes))
    row_tile = None
    d = 1
    while d * d <= rows:
        if rows % d == 0:
            for cand in (d, rows // d):
                if cand <= max_rows and (cand % 8 == 0 or cand == rows):
                    if row_tile is None or cand > row_tile:
                        row_tile = cand
        d += 1
    if row_tile is None:
        if rows * lanes * dtype_bytes <= tile_budget_bytes:
            row_tile = rows  # tiny array: single full-extent block
        else:
            return None
    return rows, lanes, row_tile


def pallas_reshape(x, out_shape):
    """Equivalent of Reshape(out_shape)(x):  x.view((B,) + out_shape)."""
    b = x.shape[0]
    n = 1
    for d in x.shape[1:]:
        n *= d
    n_out = 1
    for d in out_shape:
        n_out *= d
    assert n == n_out, f"cannot view {x.shape} as (B,) + {tuple(out_shape)}"

    final_shape = (b,) + tuple(out_shape)
    total = b * n
    dtype_bytes = jnp.dtype(x.dtype).itemsize

    slab = _pick_slab(total, dtype_bytes)
    if slab is None:
        # No lane-aligned factorization (total % 128 != 0) or it would not fit
        # VMEM as a single block.  A view-reshape is pure metadata anyway, so
        # return the zero-copy form rather than an inefficient/unsafe kernel.
        return jnp.reshape(x, final_shape)

    rows, lanes, row_tile = slab
    # Row-major flatten — identical linear element order to torch .view on a
    # contiguous tensor.
    x2d = x.reshape(rows, lanes)
    grid = (rows // row_tile,)

    y2d = pl.pallas_call(
        _copy_kernel,
        out_shape=jax.ShapeDtypeStruct((rows, lanes), x.dtype),
        grid_spec=pltpu.PrefetchScalarGridSpec(
            num_scalar_prefetch=0,
            grid=grid,
            in_specs=[pl.BlockSpec((row_tile, lanes), lambda i: (i, 0))],
            out_specs=pl.BlockSpec((row_tile, lanes), lambda i: (i, 0)),
        ),
        compiler_params=pltpu.CompilerParams(
            dimension_semantics=("parallel",),  # v7x: split rows across 2 TCs
        ),
    )(x2d)

    return y2d.reshape(final_shape)


if __name__ == "__main__":
    key = jax.random.PRNGKey(0)
    # Small NCHW feature map, as a conv stack would produce: (2, 4, 16, 16).
    x = jax.random.normal(key, (2, 4, 16, 16), dtype=jnp.float32)

    # Reshape module configured to view (4, 16, 16) -> (16, 64).
    out_shape = (16, 64)

    y = pallas_reshape(x, out_shape)
    jax.block_until_ready(y)

    # Reference: plain reshape (same semantics as torch.view on contiguous x).
    ref = x.reshape((x.shape[0],) + out_shape)
    assert y.shape == (2, 16, 64), y.shape
    assert y.dtype == x.dtype
    assert jnp.array_equal(y, ref), "mismatch vs reference reshape"

    print("KERNEL_OK")
</pallas_src>

<mosaic_0001>
module attributes {stable_mosaic.version = 11 : i64} {
  func.func @_copy_kernel(%arg0: i32, %arg1: memref<8x256xf32, #tpu.memory_space<vmem>>, %arg2: memref<8x256xf32, #tpu.memory_space<vmem>>) attributes {dimension_semantics = [#tpu.dimension_semantics<parallel>], iteration_bounds = array<i64: 1>, scalar_prefetch = 0 : i64, scratch_operands = 0 : i64, tpu.core_type = #tpu.core_type<tc>, window_params = [{transform_indices = @transform_0, window_bounds = array<i64: 8, 256>}, {transform_indices = @transform_1, window_bounds = array<i64: 8, 256>}]} {
    %c0 = arith.constant 0 : index
    %c0_0 = arith.constant 0 : index
    %0 = vector.load %arg1[%c0, %c0_0] : memref<8x256xf32, #tpu.memory_space<vmem>>, vector<8x256xf32>
    %c0_1 = arith.constant 0 : index
    %c0_2 = arith.constant 0 : index
    %1 = vector.load %arg2[%c0_1, %c0_2] : memref<8x256xf32, #tpu.memory_space<vmem>>, vector<8x256xf32>
    tpu.vector_store %arg2[%c0_1, %c0_2], %0 {strides = array<i32>} : memref<8x256xf32, #tpu.memory_space<vmem>>, vector<8x256xf32>,
    return
  }
  func.func @transform_0(%arg0: i32) -> (i32, i32) {
    %c0_i32 = arith.constant 0 : i32
    %c0_i32_0 = arith.constant 0 : i32
    return %arg0, %c0_i32 : i32, i32
  }
  func.func @transform_1(%arg0: i32) -> (i32, i32) {
    %c0_i32 = arith.constant 0 : i32
    %c0_i32_0 = arith.constant 0 : i32
    return %arg0, %c0_i32 : i32, i32
  }
}

</mosaic_0001>

<bundles_post_ra>
// kernel: tpu_custom_call.1
= control target key start
LH: loop header
LB: loop body
LE: loop exit
PB: predicated region body
PF: predicated region fallthrough
CT: control target
= control target key end

     0   :  { %6 = vsyncpa [#allocation3], 0  ;;  %s104_s0 = inlined_call_operand.hbm [shape: f32[8,256], index: 0, kind: input, shape index: {}]   ;;  %s105_s1 = inlined_call_operand.hbm [shape: f32[8,256], index: 1, kind: output, shape index: {}]  }
   0x1   :  { %7 = vsyncpa [#allocation4], 0  ;;  %s86_s6 = smov [#allocation2]  }
   0x2   :  { %s14_s7 = sshll.u32 %s86_s6, 4  ;;  %s15_s7 = int_to_ptr.vmem [resolvable:$true] %s14_s7 }
   0x3   :  { %s50_s8 = scalar_lea.vmem %s15_s7, 256  ;;  %p55_p1 = scmp.lt.s32.totalorder %s15_s7, %s15_s7 }
   0x4   :  { %p51_p0 = scmp.ne.s32.totalorder %s15_s7, %s50_s8  ;;  %p56_p2 = scmp.lt.s32.totalorder %s50_s8, %s50_s8 }
   0x6   :  { %p57_p3 = por %p56_p2, %p55_p1 }
   0x8   :  { %p58_p4 = pnand %p57_p3, %p51_p0 }
   0xa   :  { %61 = shalt.err (!%p58_p4)
}
   0xb   :  { %17 = dma.hbm_to_vmem [thread:$0]  %s104_s0, 256, %s15_s7, [#allocation3]  }
   0xc   :  { %82 = dma.done.wait [#allocation3], 256  }
   0xd   :  { %83 = vsyncadd [#allocation3], 4294967040  ;;  %s87_s11 = smov [#allocation5]   ;;  %v21_v0 = vld [vmem:[#allocation2] sm:$0xff]  ;;  %v22_v1 = vld [vmem:[#allocation2 + $0x8] sm:$0xff] }
   0xe   :  { %s31_s12 = sshll.u32 %s87_s11, 4  ;;  %23 = vst [vmem:[#allocation5] sm:$0xff] %v21_v0  ;;  %24 = vst [vmem:[#allocation5 + $0x8] sm:$0xff] %v22_v1  ;;  %s32_s12 = int_to_ptr.vmem [resolvable:$true] %s31_s12 }
   0xf   :  { %s62_s13 = scalar_lea.vmem %s32_s12, 256  ;;  %p67_p6 = scmp.lt.s32.totalorder %s32_s12, %s32_s12 }
  0x10   :  { %p63_p5 = scmp.ne.s32.totalorder %s32_s12, %s62_s13  ;;  %p68_p7 = scmp.lt.s32.totalorder %s62_s13, %s62_s13 }
  0x12   :  { %p69_p8 = por %p68_p7, %p67_p6 }
  0x14   :  { %p70_p9 = pnand %p69_p8, %p63_p5 }
  0x16   :  { %73 = shalt.err (!%p70_p9)
}
  0x17   :  { %34 = dma.vmem_to_hbm [thread:$0]  %s32_s12, 256, %s105_s1, [#allocation4]  }
  0x18   :  { %84 = dma.done.wait [#allocation4], 256  }
  0x19   :  { %85 = vsyncadd [#allocation4], 4294967040 }
  0x1a   :  { %38 = vsyncpa [#allocation3], 1 }
  0x1b   :  { %39 = vsyncpa [#allocation4], 1 }

</bundles_post_ra>
